<compile_context>
chip_gen: v5e
topology: v5e:2x2
jax: 0.10.0
libtpu: 0.0.40
codegen_flags: <defaults>
</compile_context>

<pallas_src>
import jax
import jax.numpy as jnp
from jax.experimental import pallas as pl
from jax.experimental.pallas import tpu as pltpu

LEAKY_SLOPE = 0.01  # nn.LeakyReLU default negative_slope


def _leaky_relu(h):
    # 2 VALU ops per element (mul + max) instead of cmp + select + mul.
    return jnp.maximum(h, LEAKY_SLOPE * h)


def _linear(h, w_ref, b_ref):
    # Cast to the MXU compute dtype at the matmul input only (bf16 on the
    # default perf path, no-op on the exact f32 path); accumulate in f32 and
    # add the f32 bias on the VPU.
    return (
        jnp.dot(h.astype(w_ref.dtype), w_ref[...], preferred_element_type=jnp.float32)
        + b_ref[...]
    )


def autoencoder_kernel(
    x_ref,
    w1_ref, b1_ref, w2_ref, b2_ref, w3_ref, b3_ref,   # encoder
    w4_ref, b4_ref, w5_ref, b5_ref, w6_ref, b6_ref,   # decoder
    dec_ref, enc_ref,
):
    x = x_ref[...]  # f32 in, cast happens inside _linear (VALU slack)

    # ---- encoder: Linear -> LeakyReLU -> Linear -> LeakyReLU -> Linear ----
    h = _leaky_relu(_linear(x, w1_ref, b1_ref))
    h = _leaky_relu(_linear(h, w2_ref, b2_ref))
    z = _linear(h, w3_ref, b3_ref)                    # latent code (no activation)

    # ---- decoder: Linear -> LeakyReLU -> Linear -> LeakyReLU -> Linear -> Sigmoid
    h = _leaky_relu(_linear(z, w4_ref, b4_ref))
    h = _leaky_relu(_linear(h, w5_ref, b5_ref))
    d = jax.nn.sigmoid(_linear(h, w6_ref, b6_ref))    # exp on the EUP

    # Stores are already in the packed (lane-dense) layout -- no reshape needed.
    enc_ref[...] = z.astype(enc_ref.dtype)
    dec_ref[...] = d.astype(dec_ref.dtype)


# ----------------------------------------------------------------------------
# Wrapper-side data preparation (static decisions, no compile probing).
# ----------------------------------------------------------------------------

def _pack_factor(B, input_dim):
    """How many samples to pack per lane-dense row (1 = natural layout)."""
    if input_dim >= 128 or 128 % input_dim != 0:
        return 1
    p = 128 // input_dim
    # Fall back to natural layout instead of padding B (avoids a jnp.pad HBM pass).
    return p if B % p == 0 else 1


def _block_diag(w, p):
    """p copies of w on the diagonal of a (p*in, p*out) matrix."""
    if p == 1:
        return w
    return jnp.kron(jnp.eye(p, dtype=w.dtype), w)


def _tile_bias(b, p):
    return b if p == 1 else jnp.tile(b, (1, p))


def prepare_params(params, pack, compute_dtype):
    """Build the flat (w, b, w, b, ...) list the kernel consumes. Call once and
    reuse across forward passes to avoid re-casting / re-packing weights."""
    flat = []
    for w, b in params:
        flat.append(_block_diag(w, pack).astype(compute_dtype))
        flat.append(_tile_bias(b, pack).astype(jnp.float32))
    return flat


def _pick_tiling(rows, max_tile):
    """Return (tile_rows, n_tiles, padded_rows).

    Single grid step whenever the whole batch fits in one comfortable tile
    (optimal on 1-TC v5e/v6e: no per-step overhead); otherwise an EVEN number
    of steps so v7x's two TensorCores split the parallel grid axis evenly."""
    if rows <= max_tile:
        return rows, 1, rows
    n = pl.cdiv(rows, max_tile)
    if n % 2:
        n += 1                      # even step count -> no idle TC tail on v7x
    tile = pl.cdiv(rows, n)
    tile = -(-tile // 8) * 8        # keep sublane (8) alignment for multi-tile grids
    return tile, n, tile * n


def autoencoder_forward(x, params, *, compute_dtype=jnp.bfloat16,
                        max_rows_per_tile=4096, flat_wb=None, pack=None):
    """Returns (decoded, encoded), matching Autoencoder.forward(x)."""
    B, input_dim = x.shape
    hidden_dim = params[0][0].shape[1]
    latent_dim = params[2][0].shape[1]
    out_dtype = x.dtype

    if pack is None:
        pack = _pack_factor(B, input_dim)
    if flat_wb is None:
        flat_wb = prepare_params(params, pack, compute_dtype)

    rows = B // pack
    in_width = input_dim * pack          # 128 on the packed path
    hid_width = hidden_dim * pack
    lat_width = latent_dim * pack
    # Free row-major view: each packed row holds `pack` consecutive samples.
    x_in = x.reshape(rows, in_width)

    tile, n_tiles, rows_pad = _pick_tiling(rows, max_rows_per_tile)
    if rows_pad != rows:
        # Only reachable for very large ragged batches; pads the tail tile.
        x_in = jnp.pad(x_in, ((0, rows_pad - rows), (0, 0)))

    in_specs = [pl.BlockSpec((tile, in_width), lambda i: (i, 0))]
    for arr in flat_wb:
        # Constant index map -> Pallas keeps the small weights/biases resident
        # in VMEM across grid steps (no re-DMA).
        in_specs.append(pl.BlockSpec(arr.shape, lambda i: (0, 0)))

    flops = 2 * rows_pad * (
        in_width * hid_width + hid_width * hid_width + hid_width * lat_width
        + lat_width * hid_width + hid_width * hid_width + hid_width * in_width
    )
    bytes_accessed = int(
        x_in.size * x_in.dtype.itemsize
        + sum(a.size * a.dtype.itemsize for a in flat_wb)
        + rows_pad * (in_width + lat_width) * jnp.dtype(out_dtype).itemsize
    )
    cost = pl.CostEstimate(
        flops=int(flops),
        transcendentals=int(rows_pad * in_width),   # sigmoid exp on the EUP
        bytes_accessed=bytes_accessed,
    )

    dec_p, enc_p = pl.pallas_call(
        autoencoder_kernel,
        out_shape=(
            jax.ShapeDtypeStruct((rows_pad, in_width), out_dtype),
            jax.ShapeDtypeStruct((rows_pad, lat_width), out_dtype),
        ),
        grid_spec=pl.GridSpec(
            grid=(n_tiles,),
            in_specs=in_specs,
            out_specs=[
                pl.BlockSpec((tile, in_width), lambda i: (i, 0)),
                pl.BlockSpec((tile, lat_width), lambda i: (i, 0)),
            ],
        ),
        compiler_params=pltpu.CompilerParams(
            dimension_semantics=("parallel",),
        ),
        cost_estimate=cost,
    )(x_in, *flat_wb)

    # Row-major unpack back to (B, feat) is a free view; slice drops tail padding.
    decoded = dec_p.reshape(rows_pad * pack, input_dim)[:B]
    encoded = enc_p.reshape(rows_pad * pack, latent_dim)[:B]
    return decoded, encoded


# ----------------------------------------------------------------------------
# Parameter init + plain-JAX reference for correctness checks.
# ----------------------------------------------------------------------------

def init_params(key, input_dim, latent_dim, hidden_dim=32, dtype=jnp.float32):
    """Mimics nn.Linear's default U(-1/sqrt(fan_in), +1/sqrt(fan_in)) init.
    Weights stored as (in_features, out_features); biases as (1, out_features)."""
    dims = [
        (input_dim, hidden_dim), (hidden_dim, hidden_dim), (hidden_dim, latent_dim),   # encoder
        (latent_dim, hidden_dim), (hidden_dim, hidden_dim), (hidden_dim, input_dim),   # decoder
    ]
    params = []
    for fan_in, fan_out in dims:
        key, kw, kb = jax.random.split(key, 3)
        bound = 1.0 / float(jnp.sqrt(jnp.array(fan_in, dtype=jnp.float32)))
        w = jax.random.uniform(kw, (fan_in, fan_out), dtype, -bound, bound)
        b = jax.random.uniform(kb, (1, fan_out), dtype, -bound, bound)
        params.append((w, b))
    return params


def reference_forward(x, params):
    (w1, b1), (w2, b2), (w3, b3), (w4, b4), (w5, b5), (w6, b6) = params
    lrelu = lambda h: jnp.where(h >= 0, h, LEAKY_SLOPE * h)
    h = lrelu(x @ w1 + b1)
    h = lrelu(h @ w2 + b2)
    z = h @ w3 + b3
    h = lrelu(z @ w4 + b4)
    h = lrelu(h @ w5 + b5)
    d = jax.nn.sigmoid(h @ w6 + b6)
    return d, z


if __name__ == "__main__":
    key = jax.random.PRNGKey(0)
    kx, kp = jax.random.split(key)

    # Small shapes consistent with the module: Autoencoder(input_dim=16, latent_dim=8).
    B, input_dim, latent_dim, hidden_dim = 32, 16, 8, 32
    x = jax.random.uniform(kx, (B, input_dim), jnp.float32)  # sigmoid output ~ data in [0,1]
    params = init_params(kp, input_dim, latent_dim, hidden_dim)
    dec_want, enc_want = reference_forward(x, params)

    # Exact-math path (f32 matmuls, packed lane-dense layout) -- tight tolerance.
    dec32, enc32 = autoencoder_forward(x, params, compute_dtype=jnp.float32)
    dec32, enc32 = jax.block_until_ready((dec32, enc32))
    assert dec32.shape == (B, input_dim) and enc32.shape == (B, latent_dim)
    assert jnp.allclose(dec32, dec_want, atol=1e-5, rtol=1e-5)
    assert jnp.allclose(enc32, enc_want, atol=1e-5, rtol=1e-5)

    # Default perf path (bf16 MXU inputs, f32 accumulate) -- looser tolerance.
    dec_bf, enc_bf = autoencoder_forward(x, params)
    dec_bf, enc_bf = jax.block_until_ready((dec_bf, enc_bf))
    assert jnp.allclose(dec_bf, dec_want, atol=1e-1, rtol=1e-1)
    assert jnp.allclose(enc_bf, enc_want, atol=1e-1, rtol=1e-1)

    # Larger batch: still a single grid step (64 packed rows), full-width stores.
    xb = jax.random.uniform(jax.random.PRNGKey(1), (512, input_dim), jnp.float32)
    dec_b, enc_b = autoencoder_forward(xb, params)
    dec_b, enc_b = jax.block_until_ready((dec_b, enc_b))
    dec_bw, enc_bw = reference_forward(xb, params)
    assert dec_b.shape == (512, input_dim) and enc_b.shape == (512, latent_dim)
    assert jnp.allclose(dec_b, dec_bw, atol=1e-1, rtol=1e-1)
    assert jnp.allclose(enc_b, enc_bw, atol=1e-1, rtol=1e-1)

    # Ragged batch that cannot pack (30 % 8 != 0): static fallback to the
    # natural (B, feat) layout -- no padding pass, no compile probe.
    xr = jax.random.uniform(jax.random.PRNGKey(2), (30, input_dim), jnp.float32)
    dec_r, enc_r = autoencoder_forward(xr, params, compute_dtype=jnp.float32)
    dec_r, enc_r = jax.block_until_ready((dec_r, enc_r))
    dec_rw, enc_rw = reference_forward(xr, params)
    assert dec_r.shape == (30, input_dim) and enc_r.shape == (30, latent_dim)
    assert jnp.allclose(dec_r, dec_rw, atol=1e-5, rtol=1e-5)
    assert jnp.allclose(enc_r, enc_rw, atol=1e-5, rtol=1e-5)

    print("KERNEL_OK")
</pallas_src>

<mosaic_0001>
module attributes {stable_mosaic.version = 11 : i64} {
  func.func @autoencoder_kernel(%arg0: i32, %arg1: memref<4x128xf32, #tpu.memory_space<vmem>>, %arg2: memref<128x256xf32, #tpu.memory_space<vmem>>, %arg3: memref<1x256xf32, #tpu.memory_space<vmem>>, %arg4: memref<256x256xf32, #tpu.memory_space<vmem>>, %arg5: memref<1x256xf32, #tpu.memory_space<vmem>>, %arg6: memref<256x64xf32, #tpu.memory_space<vmem>>, %arg7: memref<1x64xf32, #tpu.memory_space<vmem>>, %arg8: memref<64x256xf32, #tpu.memory_space<vmem>>, %arg9: memref<1x256xf32, #tpu.memory_space<vmem>>, %arg10: memref<256x256xf32, #tpu.memory_space<vmem>>, %arg11: memref<1x256xf32, #tpu.memory_space<vmem>>, %arg12: memref<256x128xf32, #tpu.memory_space<vmem>>, %arg13: memref<1x128xf32, #tpu.memory_space<vmem>>, %arg14: memref<4x128xf32, #tpu.memory_space<vmem>>, %arg15: memref<4x64xf32, #tpu.memory_space<vmem>>) attributes {dimension_semantics = [#tpu.dimension_semantics<parallel>], iteration_bounds = array<i64: 1>, scalar_prefetch = 0 : i64, scratch_operands = 0 : i64, tpu.core_type = #tpu.core_type<tc>, window_params = [{transform_indices = @transform_0, window_bounds = array<i64: 4, 128>}, {pipeline_mode = #tpu.pipeline_mode<synchronous>, transform_indices = @transform_1, window_bounds = array<i64: 128, 256>}, {pipeline_mode = #tpu.pipeline_mode<synchronous>, transform_indices = @transform_2, window_bounds = array<i64: 1, 256>}, {pipeline_mode = #tpu.pipeline_mode<synchronous>, transform_indices = @transform_3, window_bounds = array<i64: 256, 256>}, {pipeline_mode = #tpu.pipeline_mode<synchronous>, transform_indices = @transform_4, window_bounds = array<i64: 1, 256>}, {pipeline_mode = #tpu.pipeline_mode<synchronous>, transform_indices = @transform_5, window_bounds = array<i64: 256, 64>}, {pipeline_mode = #tpu.pipeline_mode<synchronous>, transform_indices = @transform_6, window_bounds = array<i64: 1, 64>}, {pipeline_mode = #tpu.pipeline_mode<synchronous>, transform_indices = @transform_7, window_bounds = array<i64: 64, 256>}, {pipeline_mode = #tpu.pipeline_mode<synchronous>, transform_indices = @transform_8, window_bounds = array<i64: 1, 256>}, {pipeline_mode = #tpu.pipeline_mode<synchronous>, transform_indices = @transform_9, window_bounds = array<i64: 256, 256>}, {pipeline_mode = #tpu.pipeline_mode<synchronous>, transform_indices = @transform_10, window_bounds = array<i64: 1, 256>}, {pipeline_mode = #tpu.pipeline_mode<synchronous>, transform_indices = @transform_11, window_bounds = array<i64: 256, 128>}, {pipeline_mode = #tpu.pipeline_mode<synchronous>, transform_indices = @transform_12, window_bounds = array<i64: 1, 128>}, {transform_indices = @transform_13, window_bounds = array<i64: 4, 128>}, {transform_indices = @transform_14, window_bounds = array<i64: 4, 64>}]} {
    %c0 = arith.constant 0 : index
    %c0_0 = arith.constant 0 : index
    %0 = vector.load %arg1[%c0, %c0_0] : memref<4x128xf32, #tpu.memory_space<vmem>>, vector<4x128xf32>
    %c0_1 = arith.constant 0 : index
    %c0_2 = arith.constant 0 : index
    %1 = vector.load %arg2[%c0_1, %c0_2] : memref<128x256xf32, #tpu.memory_space<vmem>>, vector<128x256xf32>
    %cst = arith.constant dense<0.000000e+00> : vector<4x256xf32>
    %2 = tpu.matmul %0, %1, %cst {dimension_numbers = #tpu.dot_dimension_numbers<[1], [0], [0], [1], [0, 0, 1, 1], [], []>} : vector<4x128xf32>, vector<128x256xf32>, vector<4x256xf32> -> vector<4x256xf32>
    %c0_3 = arith.constant 0 : index
    %c0_4 = arith.constant 0 : index
    %3 = vector.load %arg3[%c0_3, %c0_4] : memref<1x256xf32, #tpu.memory_space<vmem>>, vector<1x256xf32>
    %4 = vector.broadcast %3 : vector<1x256xf32> to vector<4x256xf32>
    %5 = arith.addf %2, %4 : vector<4x256xf32>
    %cst_5 = arith.constant 0.00999999977 : f32
    %6 = vector.broadcast %cst_5 : f32 to vector<4x256xf32>
    %7 = arith.mulf %6, %5 : vector<4x256xf32>
    %8 = arith.maximumf %5, %7 : vector<4x256xf32>
    %c0_6 = arith.constant 0 : index
    %c0_7 = arith.constant 0 : index
    %9 = vector.load %arg4[%c0_6, %c0_7] : memref<256x256xf32, #tpu.memory_space<vmem>>, vector<256x256xf32>
    %cst_8 = arith.constant dense<0.000000e+00> : vector<4x256xf32>
    %10 = tpu.matmul %8, %9, %cst_8 {dimension_numbers = #tpu.dot_dimension_numbers<[1], [0], [0], [1], [0, 0, 1, 1], [], []>} : vector<4x256xf32>, vector<256x256xf32>, vector<4x256xf32> -> vector<4x256xf32>
    %c0_9 = arith.constant 0 : index
    %c0_10 = arith.constant 0 : index
    %11 = vector.load %arg5[%c0_9, %c0_10] : memref<1x256xf32, #tpu.memory_space<vmem>>, vector<1x256xf32>
    %12 = vector.broadcast %11 : vector<1x256xf32> to vector<4x256xf32>
    %13 = arith.addf %10, %12 : vector<4x256xf32>
    %cst_11 = arith.constant 0.00999999977 : f32
    %14 = vector.broadcast %cst_11 : f32 to vector<4x256xf32>
    %15 = arith.mulf %14, %13 : vector<4x256xf32>
    %16 = arith.maximumf %13, %15 : vector<4x256xf32>
    %c0_12 = arith.constant 0 : index
    %c0_13 = arith.constant 0 : index
    %17 = vector.load %arg6[%c0_12, %c0_13] : memref<256x64xf32, #tpu.memory_space<vmem>>, vector<256x64xf32>
    %cst_14 = arith.constant dense<0.000000e+00> : vector<4x64xf32>
    %18 = tpu.matmul %16, %17, %cst_14 {dimension_numbers = #tpu.dot_dimension_numbers<[1], [0], [0], [1], [0, 0, 1, 1], [], []>} : vector<4x256xf32>, vector<256x64xf32>, vector<4x64xf32> -> vector<4x64xf32>
    %c0_15 = arith.constant 0 : index
    %c0_16 = arith.constant 0 : index
    %19 = vector.load %arg7[%c0_15, %c0_16] : memref<1x64xf32, #tpu.memory_space<vmem>>, vector<1x64xf32>
    %20 = vector.broadcast %19 : vector<1x64xf32> to vector<4x64xf32>
    %21 = arith.addf %18, %20 : vector<4x64xf32>
    %c0_17 = arith.constant 0 : index
    %c0_18 = arith.constant 0 : index
    %22 = vector.load %arg8[%c0_17, %c0_18] : memref<64x256xf32, #tpu.memory_space<vmem>>, vector<64x256xf32>
    %cst_19 = arith.constant dense<0.000000e+00> : vector<4x256xf32>
    %23 = tpu.matmul %21, %22, %cst_19 {dimension_numbers = #tpu.dot_dimension_numbers<[1], [0], [0], [1], [0, 0, 1, 1], [], []>} : vector<4x64xf32>, vector<64x256xf32>, vector<4x256xf32> -> vector<4x256xf32>
    %c0_20 = arith.constant 0 : index
    %c0_21 = arith.constant 0 : index
    %24 = vector.load %arg9[%c0_20, %c0_21] : memref<1x256xf32, #tpu.memory_space<vmem>>, vector<1x256xf32>
    %25 = vector.broadcast %24 : vector<1x256xf32> to vector<4x256xf32>
    %26 = arith.addf %23, %25 : vector<4x256xf32>
    %cst_22 = arith.constant 0.00999999977 : f32
    %27 = vector.broadcast %cst_22 : f32 to vector<4x256xf32>
    %28 = arith.mulf %27, %26 : vector<4x256xf32>
    %29 = arith.maximumf %26, %28 : vector<4x256xf32>
    %c0_23 = arith.constant 0 : index
    %c0_24 = arith.constant 0 : index
    %30 = vector.load %arg10[%c0_23, %c0_24] : memref<256x256xf32, #tpu.memory_space<vmem>>, vector<256x256xf32>
    %cst_25 = arith.constant dense<0.000000e+00> : vector<4x256xf32>
    %31 = tpu.matmul %29, %30, %cst_25 {dimension_numbers = #tpu.dot_dimension_numbers<[1], [0], [0], [1], [0, 0, 1, 1], [], []>} : vector<4x256xf32>, vector<256x256xf32>, vector<4x256xf32> -> vector<4x256xf32>
    %c0_26 = arith.constant 0 : index
    %c0_27 = arith.constant 0 : index
    %32 = vector.load %arg11[%c0_26, %c0_27] : memref<1x256xf32, #tpu.memory_space<vmem>>, vector<1x256xf32>
    %33 = vector.broadcast %32 : vector<1x256xf32> to vector<4x256xf32>
    %34 = arith.addf %31, %33 : vector<4x256xf32>
    %cst_28 = arith.constant 0.00999999977 : f32
    %35 = vector.broadcast %cst_28 : f32 to vector<4x256xf32>
    %36 = arith.mulf %35, %34 : vector<4x256xf32>
    %37 = arith.maximumf %34, %36 : vector<4x256xf32>
    %c0_29 = arith.constant 0 : index
    %c0_30 = arith.constant 0 : index
    %38 = vector.load %arg12[%c0_29, %c0_30] : memref<256x128xf32, #tpu.memory_space<vmem>>, vector<256x128xf32>
    %cst_31 = arith.constant dense<0.000000e+00> : vector<4x128xf32>
    %39 = tpu.matmul %37, %38, %cst_31 {dimension_numbers = #tpu.dot_dimension_numbers<[1], [0], [0], [1], [0, 0, 1, 1], [], []>} : vector<4x256xf32>, vector<256x128xf32>, vector<4x128xf32> -> vector<4x128xf32>
    %c0_32 = arith.constant 0 : index
    %c0_33 = arith.constant 0 : index
    %40 = vector.load %arg13[%c0_32, %c0_33] : memref<1x128xf32, #tpu.memory_space<vmem>>, vector<1x128xf32>
    %41 = vector.broadcast %40 : vector<1x128xf32> to vector<4x128xf32>
    %42 = arith.addf %39, %41 : vector<4x128xf32>
    %43 = arith.negf %42 : vector<4x128xf32>
    %44 = math.exp %43 : vector<4x128xf32>
    %cst_34 = arith.constant 1.000000e+00 : f32
    %45 = vector.broadcast %cst_34 : f32 to vector<4x128xf32>
    %46 = arith.addf %45, %44 : vector<4x128xf32>
    %47 = arith.divf %45, %46 : vector<4x128xf32>
    %c0_35 = arith.constant 0 : index
    %c0_36 = arith.constant 0 : index
    %48 = vector.load %arg15[%c0_35, %c0_36] : memref<4x64xf32, #tpu.memory_space<vmem>>, vector<4x64xf32>
    tpu.vector_store %arg15[%c0_35, %c0_36], %21 {strides = array<i32>} : memref<4x64xf32, #tpu.memory_space<vmem>>, vector<4x64xf32>,
    %c0_37 = arith.constant 0 : index
    %c0_38 = arith.constant 0 : index
    %49 = vector.load %arg14[%c0_37, %c0_38] : memref<4x128xf32, #tpu.memory_space<vmem>>, vector<4x128xf32>
    tpu.vector_store %arg14[%c0_37, %c0_38], %47 {strides = array<i32>} : memref<4x128xf32, #tpu.memory_space<vmem>>, vector<4x128xf32>,
    return
  }
  func.func @transform_0(%arg0: i32) -> (i32, i32) {
    %c0_i32 = arith.constant 0 : i32
    %c0_i32_0 = arith.constant 0 : i32
    return %arg0, %c0_i32 : i32, i32
  }
  func.func @transform_1(%arg0: i32) -> (i32, i32) {
    %c0_i32 = arith.constant 0 : i32
    %c0_i32_0 = arith.constant 0 : i32
    %c0_i32_1 = arith.constant 0 : i32
    return %c0_i32, %c0_i32_0 : i32, i32
  }
  func.func @transform_2(%arg0: i32) -> (i32, i32) {
    %c0_i32 = arith.constant 0 : i32
    %c0_i32_0 = arith.constant 0 : i32
    %c0_i32_1 = arith.constant 0 : i32
    return %c0_i32, %c0_i32_0 : i32, i32
  }
  func.func @transform_3(%arg0: i32) -> (i32, i32) {
    %c0_i32 = arith.constant 0 : i32
    %c0_i32_0 = arith.constant 0 : i32
    %c0_i32_1 = arith.constant 0 : i32
    return %c0_i32, %c0_i32_0 : i32, i32
  }
  func.func @transform_4(%arg0: i32) -> (i32, i32) {
    %c0_i32 = arith.constant 0 : i32
    %c0_i32_0 = arith.constant 0 : i32
    %c0_i32_1 = arith.constant 0 : i32
    return %c0_i32, %c0_i32_0 : i32, i32
  }
  func.func @transform_5(%arg0: i32) -> (i32, i32) {
    %c0_i32 = arith.constant 0 : i32
    %c0_i32_0 = arith.constant 0 : i32
    %c0_i32_1 = arith.constant 0 : i32
    return %c0_i32, %c0_i32_0 : i32, i32
  }
  func.func @transform_6(%arg0: i32) -> (i32, i32) {
    %c0_i32 = arith.constant 0 : i32
    %c0_i32_0 = arith.constant 0 : i32
    %c0_i32_1 = arith.constant 0 : i32
    return %c0_i32, %c0_i32_0 : i32, i32
  }
  func.func @transform_7(%arg0: i32) -> (i32, i32) {
    %c0_i32 = arith.constant 0 : i32
    %c0_i32_0 = arith.constant 0 : i32
    %c0_i32_1 = arith.constant 0 : i32
    return %c0_i32, %c0_i32_0 : i32, i32
  }
  func.func @transform_8(%arg0: i32) -> (i32, i32) {
    %c0_i32 = arith.constant 0 : i32
    %c0_i32_0 = arith.constant 0 : i32
    %c0_i32_1 = arith.constant 0 : i32
    return %c0_i32, %c0_i32_0 : i32, i32
  }
  func.func @transform_9(%arg0: i32) -> (i32, i32) {
    %c0_i32 = arith.constant 0 : i32
    %c0_i32_0 = arith.constant 0 : i32
    %c0_i32_1 = arith.constant 0 : i32
    return %c0_i32, %c0_i32_0 : i32, i32
  }
  func.func @transform_10(%arg0: i32) -> (i32, i32) {
    %c0_i32 = arith.constant 0 : i32
    %c0_i32_0 = arith.constant 0 : i32
    %c0_i32_1 = arith.constant 0 : i32
    return %c0_i32, %c0_i32_0 : i32, i32
  }
  func.func @transform_11(%arg0: i32) -> (i32, i32) {
    %c0_i32 = arith.constant 0 : i32
    %c0_i32_0 = arith.constant 0 : i32
    %c0_i32_1 = arith.constant 0 : i32
    return %c0_i32, %c0_i32_0 : i32, i32
  }
  func.func @transform_12(%arg0: i32) -> (i32, i32) {
    %c0_i32 = arith.constant 0 : i32
    %c0_i32_0 = arith.constant 0 : i32
    %c0_i32_1 = arith.constant 0 : i32
    return %c0_i32, %c0_i32_0 : i32, i32
  }
  func.func @transform_13(%arg0: i32) -> (i32, i32) {
    %c0_i32 = arith.constant 0 : i32
    %c0_i32_0 = arith.constant 0 : i32
    return %arg0, %c0_i32 : i32, i32
  }
  func.func @transform_14(%arg0: i32) -> (i32, i32) {
    %c0_i32 = arith.constant 0 : i32
    %c0_i32_0 = arith.constant 0 : i32
    return %arg0, %c0_i32 : i32, i32
  }
}

</mosaic_0001>

<bundles_post_ra>
// kernel: tpu_custom_call.1
= control target key start
LH: loop header
LB: loop body
LE: loop exit
PB: predicated region body
PF: predicated region fallthrough
CT: control target
= control target key end

     0   :  { %20 = vsyncpa [#allocation3], 0  ;;  %s1434_s0 = inlined_call_operand.hbm [shape: f32[4,128], index: 0, kind: input, shape index: {}]   ;;  %s1435_s1 = inlined_call_operand.vmem [shape: f32[128,256], index: 1, kind: input, shape index: {}]   ;;  %s1436_s2 = inlined_call_operand.hbm [shape: f32[1,256], index: 2, kind: input, shape index: {}]   ;;  %s1437_s3 = inlined_call_operand.hbm [shape: f32[256,256], index: 3, kind: input, shape index: {}]   ;;  %s1438_s4 = inlined_call_operand.hbm [shape: f32[1,256], index: 4, kind: input, shape index: {}]   ;;  %s1439_s5 = inlined_call_operand.vmem [shape: f32[256,64], index: 5, kind: input, shape index: {}]   ;;  %s1440_s6 = inlined_call_operand.hbm [shape: f32[1,64], index: 6, kind: input, shape index: {}]   ;;  %s1441_s7 = inlined_call_operand.vmem [shape: f32[64,256], index: 7, kind: input, shape index: {}]   ;;  %s1442_s8 = inlined_call_operand.vmem [shape: f32[1,256], index: 8, kind: input, shape index: {}]   ;;  %s1443_s9 = inlined_call_operand.hbm [shape: f32[256,256], index: 9, kind: input, shape index: {}]   ;;  %s1444_s10 = inlined_call_operand.vmem [shape: f32[1,256], index: 10, kind: input, shape index: {}]   ;;  %s1445_s11 = inlined_call_operand.hbm [shape: f32[256,128], index: 11, kind: input, shape index: {}]   ;;  %s1446_s12 = inlined_call_operand.vmem [shape: f32[1,128], index: 12, kind: input, shape index: {}]   ;;  %s1447_s13 = inlined_call_operand.hbm [shape: f32[4,128], index: 13, kind: output, shape index: {0}]   ;;  %s1448_s14 = inlined_call_operand.hbm [shape: f32[4,64], index: 14, kind: output, shape index: {1}]  }
   0x1   :  { %21 = vsyncpa [#allocation6], 0 }
   0x2   :  { %22 = vsyncpa [#allocation9], 0 }
   0x3   :  { %23 = vsyncpa [#allocation12], 0 }
   0x4   :  { %24 = vsyncpa [#allocation4], 0  ;;  %s44_s15 = sshll.u32 %s1436_s2, 4  ;;  %s45_s15 = int_to_ptr.hbm [resolvable:$true] %s44_s15 }
   0x5   :  { %25 = vsyncpa [#allocation16], 0  ;;  %s1070_s16 = smov [#allocation5]   ;;  %s68_s20 = sshll.u32 %s1438_s4, 4  ;;  %s69_s20 = int_to_ptr.hbm [resolvable:$true] %s68_s20 }
   0x6   :  { %s46_s17 = sshll.u32 %s1070_s16, 4  ;;  %s1071_s21 = smov [#allocation8]   ;;  %s47_s17 = int_to_ptr.vmem [resolvable:$true] %s46_s17 }
   0x7   :  { %49 = dma.hbm_to_vmem [thread:$0]  %s45_s15, 32, %s47_s17, [#allocation6]  }
   0x8   :  { %s70_s22 = sshll.u32 %s1071_s21, 4  ;;  %s95_s25 = sshll.u32 %s1443_s9, 4  ;;  %s71_s22 = int_to_ptr.vmem [resolvable:$true] %s70_s22  ;;  %s96_s25 = int_to_ptr.hbm [resolvable:$true] %s95_s25 }
   0x9   :  { %73 = dma.hbm_to_vmem [thread:$0]  %s69_s20, 32, %s71_s22, [#allocation9]  }
   0xa   :  { %s1072_s2 = smov [#allocation11]   ;;  %s31_s29 = sshll.u32 %s1434_s0, 4  ;;  %s32_s29 = int_to_ptr.hbm [resolvable:$true] %s31_s29 }
   0xb   :  { %s97_s26 = sshll.u32 %s1072_s2, 4  ;;  %s1073_s30 = smov 256   ;;  %s98_s26 = int_to_ptr.vmem [resolvable:$true] %s97_s26 }
   0xc   :  { %s1074_s4 = smov 16   ;;  %s1075_s15 = smov [#allocation2]  }
   0xd   :  { %103 = dma.hbm_to_vmem [thread:$0]  %s96_s25, 8192, %s98_s26, [#allocation12], %s1073_s30, %s1073_s30, %s1074_s4  }
   0xe   :  { %s33_s16 = sshll.u32 %s1075_s15, 4  ;;  %s54_s19 = sshll.u32 %s1437_s3, 4  ;;  %s34_s16 = int_to_ptr.vmem [resolvable:$true] %s33_s16  ;;  %s55_s19 = int_to_ptr.hbm [resolvable:$true] %s54_s19 }
   0xf   :  { %36 = dma.hbm_to_vmem [thread:$0]  %s32_s29, 64, %s34_s16, [#allocation3]  }
  0x10   :  { %s81_s21 = sshll.u32 %s1440_s6, 4  ;;  %s1076_s22 = smov [#allocation7]   ;;  %s82_s21 = int_to_ptr.hbm [resolvable:$true] %s81_s21 }
  0x11   :  { %s56_s23 = sshll.u32 %s1076_s22, 4  ;;  %s1077_s0 = smov [#allocation10]   ;;  %s57_s23 = int_to_ptr.vmem [resolvable:$true] %s56_s23 }
  0x12   :  { %62 = dma.hbm_to_vmem [thread:$0]  %s55_s19, 8192, %s57_s23, [#allocation6], %s1073_s30, %s1073_s30, %s1074_s4  }
  0x13   :  { %s83_s24 = sshll.u32 %s1077_s0, 4  ;;  %s110_s26 = sshll.u32 %s1445_s11, 4  ;;  %s84_s24 = int_to_ptr.vmem [resolvable:$true] %s83_s24  ;;  %s111_s26 = int_to_ptr.hbm [resolvable:$true] %s110_s26 }
  0x14   :  { %86 = dma.hbm_to_vmem [thread:$0]  %s82_s21, 16, %s84_s24, [#allocation9]  }
  0x15   :  { %s1078_s3 = smov [#allocation13]   ;;  %s1079_s28 = smov 128  }
  0x16   :  { %s112_s27 = sshll.u32 %s1078_s3, 4  ;;  %s1080_s29 = smov 8   ;;  %s113_s27 = int_to_ptr.vmem [resolvable:$true] %s112_s27 }
  0x17   :  { %118 = dma.hbm_to_vmem [thread:$0]  %s111_s26, 4096, %s113_s27, [#allocation12], %s1079_s28, %s1079_s28, %s1080_s29  }
  0x18   :  { %1058 = dma.done.wait [#allocation3], 64  }
  0x19   :  { %1059 = vsyncadd [#allocation3], 4294967232 }
  0x1a   :  { %1060 = dma.done.wait [#allocation6], 8224  }
  0x1b   :  { %1061 = vsyncadd [#allocation6], 4294959072 }
  0x1c   :  { %1062 = dma.done.wait [#allocation9], 48  }
  0x1d   :  { %1063 = vsyncadd [#allocation9], 4294967248 }
  0x1e   :  { %1064 = dma.done.wait [#allocation12], 12288  }
  0x1f   :  { %1065 = vsyncadd [#allocation12], 4294955008  ;;  %v180_v0 = vld [vmem:[%s1435_s1 + $0xf0] sm:$0xff]  ;;  %v181_v1 = vld [vmem:[%s1435_s1 + $0xf8] sm:$0xff]  ;;  %vm484_vm0 = vcmask 523264   ;;  %vm781_vm1 = vcmask 519168  }
  0x20   :  { %v178_v2 = vld [vmem:[%s1435_s1 + $0xe0] sm:$0xff]  ;;  %188 = vmatpush.msra.mxu0 %v180_v0  ;;  %208 = vmatpush.msra.mxu1 %v181_v1  ;;  %v179_v3 = vld [vmem:[%s1435_s1 + $0xe8] sm:$0xff]  ;;  %v176_v4 = vld [vmem:[%s1435_s1 + $0xd0] sm:$0xff]  ;;  %s802_s27 = sshll.u32 %s1448_s14, 4  ;;  %s1082_s14 = smov [#allocation14]   ;;  %s803_s27 = int_to_ptr.hbm [resolvable:$true] %s802_s27 }
  0x21   :  { %v177_v5 = vld [vmem:[%s1435_s1 + $0xd8] sm:$0xff]  ;;  %v174_v6 = vld [vmem:[%s1435_s1 + $0xc0] sm:$0xff]  ;;  %v175_v7 = vld [vmem:[%s1435_s1 + $0xc8] sm:$0xff]  ;;  %s789_s6 = sshll.u32 %s1082_s14, 4  ;;  %s791_s11 = sshll.u32 %s1447_s13, 4  ;;  %s790_s6 = int_to_ptr.vmem [resolvable:$true] %s789_s6  ;;  %s792_s11 = int_to_ptr.hbm [resolvable:$true] %s791_s11 }
  0x22   :  { %189 = vmatpush.msra.mxu0 %v178_v2  ;;  %209 = vmatpush.msra.mxu1 %v179_v3  ;;  %v172_v8 = vld [vmem:[%s1435_s1 + $0xb0] sm:$0xff]  ;;  %v173_v9 = vld [vmem:[%s1435_s1 + $0xb8] sm:$0xff]  ;;  %v170_v10 = vld [vmem:[%s1435_s1 + $0xa0] sm:$0xff] }
  0x23   :  { %v171_v11 = vld [vmem:[%s1435_s1 + $0xa8] sm:$0xff]  ;;  %v168_v12 = vld [vmem:[%s1435_s1 + $0x90] sm:$0xff]  ;;  %v169_v13 = vld [vmem:[%s1435_s1 + $0x98] sm:$0xff] }
  0x24   :  { %190 = vmatpush.msra.mxu0 %v176_v4  ;;  %210 = vmatpush.msra.mxu1 %v177_v5  ;;  %v166_v14 = vld [vmem:[%s1435_s1 + $0x80] sm:$0xff]  ;;  %v262_v15 = vld [vmem:[#allocation7 + $0xf0] sm:$0xff]  ;;  %v167_v17 = vld [vmem:[%s1435_s1 + $0x88] sm:$0xff] }
  0x25   :  { %v294_v16 = vld [vmem:[#allocation7 + $0x1f0] sm:$0xff]  ;;  %302 = vmatpush.msra.mxu2 %v262_v15  ;;  %v260_v18 = vld [vmem:[#allocation7 + $0xe0] sm:$0xff]  ;;  %v149_v52 = vld [vmem:[#allocation2] sm:$0xf] }
  0x26   :  { %191 = vmatpush.msra.mxu0 %v174_v6  ;;  %211 = vmatpush.msra.mxu1 %v175_v7  ;;  %v292_v19 = vld [vmem:[#allocation7 + $0x1e0] sm:$0xff]  ;;  %v258_v20 = vld [vmem:[#allocation7 + $0xd0] sm:$0xff]  ;;  %v263_v53 = vld [vmem:[#allocation7 + $0xf8] sm:$0xff] }
  0x27   :  { %322 = vmatpush.msra.mxu3 %v294_v16  ;;  %v164_v21 = vld [vmem:[%s1435_s1 + $0x70] sm:$0xff]  ;;  %v165_v22 = vld [vmem:[%s1435_s1 + $0x78] sm:$0xff]  ;;  %303 = vmatpush.msra.mxu2 %v260_v18  ;;  %v256_v24 = vld [vmem:[#allocation7 + $0xc0] sm:$0xff] }
  0x28   :  { %192 = vmatpush.msra.mxu0 %v172_v8  ;;  %212 = vmatpush.msra.mxu1 %v173_v9  ;;  %v290_v23 = vld [vmem:[#allocation7 + $0x1d0] sm:$0xff]  ;;  %v288_v25 = vld [vmem:[#allocation7 + $0x1c0] sm:$0xff]  ;;  %v295_v54 = vld [vmem:[#allocation7 + $0x1f8] sm:$0xff] }
  0x29   :  { %323 = vmatpush.msra.mxu3 %v292_v19  ;;  %v162_v26 = vld [vmem:[%s1435_s1 + $0x60] sm:$0xff]  ;;  %v163_v27 = vld [vmem:[%s1435_s1 + $0x68] sm:$0xff]  ;;  %304 = vmatpush.msra.mxu2 %v258_v20  ;;  %v254_v28 = vld [vmem:[#allocation7 + $0xb0] sm:$0xff] }
  0x2a   :  { %193 = vmatpush.msra.mxu0 %v170_v10  ;;  %213 = vmatpush.msra.mxu1 %v171_v11  ;;  %v286_v29 = vld [vmem:[#allocation7 + $0x1b0] sm:$0xff]  ;;  %v252_v32 = vld [vmem:[#allocation7 + $0xa0] sm:$0xff]  ;;  %v261_v57 = vld [vmem:[#allocation7 + $0xe8] sm:$0xff] }
  0x2b   :  { %324 = vmatpush.msra.mxu3 %v290_v23  ;;  %v160_v30 = vld [vmem:[%s1435_s1 + $0x50] sm:$0xff]  ;;  %v161_v31 = vld [vmem:[%s1435_s1 + $0x58] sm:$0xff]  ;;  %305 = vmatpush.msra.mxu2 %v256_v24  ;;  %v284_v33 = vld [vmem:[#allocation7 + $0x1a0] sm:$0xff] }
  0x2c   :  { %194 = vmatpush.msra.mxu0 %v168_v12  ;;  %214 = vmatpush.msra.mxu1 %v169_v13  ;;  %v158_v34 = vld [vmem:[%s1435_s1 + $0x40] sm:$0xff]  ;;  %v159_v35 = vld [vmem:[%s1435_s1 + $0x48] sm:$0xff]  ;;  %v250_v36 = vld [vmem:[#allocation7 + $0x90] sm:$0xff] }
  0x2d   :  { %325 = vmatpush.msra.mxu3 %v288_v25  ;;  %306 = vmatpush.msra.mxu2 %v254_v28  ;;  %v282_v37 = vld [vmem:[#allocation7 + $0x190] sm:$0xff]  ;;  %v248_v40 = vld [vmem:[#allocation7 + $0x80] sm:$0xff]  ;;  %v293_v58 = vld [vmem:[#allocation7 + $0x1e8] sm:$0xff] }
  0x2e   :  { %195 = vmatpush.msra.mxu0 %v166_v14  ;;  %215 = vmatpush.msra.mxu1 %v167_v17  ;;  %v156_v38 = vld [vmem:[%s1435_s1 + $0x30] sm:$0xff]  ;;  %v157_v39 = vld [vmem:[%s1435_s1 + $0x38] sm:$0xff]  ;;  %v280_v41 = vld [vmem:[#allocation7 + $0x180] sm:$0xff] }
  0x2f   :  { %326 = vmatpush.msra.mxu3 %v286_v29  ;;  %307 = vmatpush.msra.mxu2 %v252_v32  ;;  %v154_v42 = vld [vmem:[%s1435_s1 + $0x20] sm:$0xff]  ;;  %v155_v43 = vld [vmem:[%s1435_s1 + $0x28] sm:$0xff]  ;;  %v246_v44 = vld [vmem:[#allocation7 + $0x70] sm:$0xff] }
  0x30   :  { %196 = vmatpush.msra.mxu0 %v164_v21  ;;  %216 = vmatpush.msra.mxu1 %v165_v22  ;;  %v278_v45 = vld [vmem:[#allocation7 + $0x170] sm:$0xff]  ;;  %v244_v48 = vld [vmem:[#allocation7 + $0x60] sm:$0xff]  ;;  %v259_v61 = vld [vmem:[#allocation7 + $0xd8] sm:$0xff] }
  0x31   :  { %327 = vmatpush.msra.mxu3 %v284_v33  ;;  %308 = vmatpush.msra.mxu2 %v250_v36  ;;  %v152_v46 = vld [vmem:[%s1435_s1 + $0x10] sm:$0xff]  ;;  %v153_v47 = vld [vmem:[%s1435_s1 + $0x18] sm:$0xff]  ;;  %v276_v49 = vld [vmem:[#allocation7 + $0x160] sm:$0xff] }
  0x32   :  { %197 = vmatpush.msra.mxu0 %v162_v26  ;;  %217 = vmatpush.msra.mxu1 %v163_v27  ;;  %v150_v50 = vld [vmem:[%s1435_s1] sm:$0xff]  ;;  %v151_v51 = vld [vmem:[%s1435_s1 + $0x8] sm:$0xff]  ;;  %v242_v55 = vld [vmem:[#allocation7 + $0x50] sm:$0xff]  ;;  %s1081_s1 = smov [#allocation15]  }
  0x33   :  { %328 = vmatpush.msra.mxu3 %v282_v37  ;;  %309 = vmatpush.msra.mxu2 %v248_v40  ;;  %v274_v56 = vld [vmem:[#allocation7 + $0x150] sm:$0xff]  ;;  %v240_v59 = vld [vmem:[#allocation7 + $0x40] sm:$0xff]  ;;  %v291_v62 = vld [vmem:[#allocation7 + $0x1d8] sm:$0xff]  ;;  %s800_s26 = sshll.u32 %s1081_s1, 4  ;;  %s801_s26 = int_to_ptr.vmem [resolvable:$true] %s800_s26 }
  0x34   :  { %198 = vmatpush.msra.mxu0 %v160_v30  ;;  %218 = vmatpush.msra.mxu1 %v161_v31  ;;  %v272_v60 = vld [vmem:[#allocation7 + $0x140] sm:$0xff]  ;;  %v257_v63 = vld [vmem:[#allocation7 + $0xc8] sm:$0xff]  ;;  %v255_v1 = vld [vmem:[#allocation7 + $0xb8] sm:$0xff] }
  0x35   :  { %329 = vmatpush.msra.mxu3 %v280_v41  ;;  %310 = vmatpush.msra.mxu2 %v246_v44  ;;  %v289_v0 = vld [vmem:[#allocation7 + $0x1c8] sm:$0xff]  ;;  %v287_v2 = vld [vmem:[#allocation7 + $0x1b8] sm:$0xff]  ;;  %v238_v17 = vld [vmem:[#allocation7 + $0x30] sm:$0xff] }
  0x36   :  { %199 = vmatpush.msra.mxu0 %v158_v34  ;;  %219 = vmatpush.msra.mxu1 %v159_v35  ;;  %v253_v3 = vld [vmem:[#allocation7 + $0xa8] sm:$0xff]  ;;  %v251_v5 = vld [vmem:[#allocation7 + $0x98] sm:$0xff]  ;;  %v270_v18 = vld [vmem:[#allocation7 + $0x130] sm:$0xff] }
  0x37   :  { %330 = vmatpush.msra.mxu3 %v278_v45  ;;  %311 = vmatpush.msra.mxu2 %v244_v48  ;;  %v285_v4 = vld [vmem:[#allocation7 + $0x1a8] sm:$0xff]  ;;  %v283_v6 = vld [vmem:[#allocation7 + $0x198] sm:$0xff]  ;;  %v236_v21 = vld [vmem:[#allocation7 + $0x20] sm:$0xff] }
  0x38   :  { %200 = vmatpush.msra.mxu0 %v156_v38  ;;  %220 = vmatpush.msra.mxu1 %v157_v39  ;;  %v249_v7 = vld [vmem:[#allocation7 + $0x88] sm:$0xff]  ;;  %v247_v9 = vld [vmem:[#allocation7 + $0x78] sm:$0xff]  ;;  %v268_v22 = vld [vmem:[#allocation7 + $0x120] sm:$0xff] }
  0x39   :  { %331 = vmatpush.msra.mxu3 %v276_v49  ;;  %312 = vmatpush.msra.mxu2 %v242_v55  ;;  %v281_v8 = vld [vmem:[#allocation7 + $0x188] sm:$0xff]  ;;  %v279_v10 = vld [vmem:[#allocation7 + $0x178] sm:$0xff]  ;;  %v234_v25 = vld [vmem:[#allocation7 + $0x10] sm:$0xff] }
  0x3a   :  { %201 = vmatpush.msra.mxu0 %v154_v42  ;;  %221 = vmatpush.msra.mxu1 %v155_v43  ;;  %v245_v11 = vld [vmem:[#allocation7 + $0x68] sm:$0xff]  ;;  %v243_v13 = vld [vmem:[#allocation7 + $0x58] sm:$0xff]  ;;  %v266_v26 = vld [vmem:[#allocation7 + $0x110] sm:$0xff] }
  0x3b   :  { %332 = vmatpush.msra.mxu3 %v274_v56  ;;  %313 = vmatpush.msra.mxu2 %v240_v59  ;;  %v277_v12 = vld [vmem:[#allocation7 + $0x168] sm:$0xff]  ;;  %v275_v14 = vld [vmem:[#allocation7 + $0x158] sm:$0xff]  ;;  %v232_v29 = vld [vmem:[#allocation7] sm:$0xff] }
  0x3c   :  { %202 = vmatpush.msra.mxu0 %v152_v46  ;;  %222 = vmatpush.msra.mxu1 %v153_v47  ;;  %v241_v15 = vld [vmem:[#allocation7 + $0x48] sm:$0xff]  ;;  %v239_v19 = vld [vmem:[#allocation7 + $0x38] sm:$0xff]  ;;  %v264_v30 = vld [vmem:[#allocation7 + $0x100] sm:$0xff] }
  0x3d   :  { %333 = vmatpush.msra.mxu3 %v272_v60  ;;  %v273_v16 = vld [vmem:[#allocation7 + $0x148] sm:$0xff]  ;;  %314 = vmatpush.msra.mxu2 %v238_v17  ;;  %v271_v20 = vld [vmem:[#allocation7 + $0x138] sm:$0xff] }
  0x3e   :  { %203 = vmatpush.msra.mxu0 %v150_v50  ;;  %223 = vmatpush.msra.mxu1 %v151_v51  ;;  %v237_v23 = vld [vmem:[#allocation7 + $0x28] sm:$0xff]  ;;  %v235_v27 = vld [vmem:[#allocation7 + $0x18] sm:$0xff] }
  0x3f   :  { %204 = vmatmul.f32.vlgmr.msra.gmra.mxu0 %v149_v52  ;;  %224 = vmatmul.f32.vlgmr.msra.gmra.mxu1 %v149_v52  ;;  %v269_v24 = vld [vmem:[#allocation7 + $0x128] sm:$0xff]  ;;  %v267_v28 = vld [vmem:[#allocation7 + $0x118] sm:$0xff] }
  0x40   :  { %342 = vmatpush.msrb.mxu0 %v263_v53  ;;  %362 = vmatpush.msrb.mxu1 %v295_v54  ;;  %v233_v31 = vld [vmem:[#allocation7 + $0x8] sm:$0xff]  ;;  %v417_v33 = vld [vmem:[%s1439_s5 + $0xf8] sm:$0xff]  ;;  %v414_v39 = vld [vmem:[%s1439_s5 + $0xe0] sm:$0xff] }
  0x41   :  { %334 = vmatpush.msra.mxu3 %v270_v18  ;;  %315 = vmatpush.msra.mxu2 %v236_v21  ;;  %v265_v32 = vld [vmem:[#allocation7 + $0x108] sm:$0xff]  ;;  %v401_v35 = vld [vmem:[%s1439_s5 + $0x78] sm:$0xff]  ;;  %v398_v40 = vld [vmem:[%s1439_s5 + $0x60] sm:$0xff] }
  0x42   :  { %343 = vmatpush.msrb.mxu0 %v261_v57  ;;  %363 = vmatpush.msrb.mxu1 %v293_v58  ;;  %v416_v34 = vld [vmem:[%s1439_s5 + $0xf0] sm:$0xff]  ;;  %v415_v37 = vld [vmem:[%s1439_s5 + $0xe8] sm:$0xff]  ;;  %v413_v41 = vld [vmem:[%s1439_s5 + $0xd8] sm:$0xff] }
  0x43   :  { %335 = vmatpush.msra.mxu3 %v268_v22  ;;  %316 = vmatpush.msra.mxu2 %v234_v25  ;;  %v400_v36 = vld [vmem:[%s1439_s5 + $0x70] sm:$0xff]  ;;  %v399_v38 = vld [vmem:[%s1439_s5 + $0x68] sm:$0xff]  ;;  %v397_v42 = vld [vmem:[%s1439_s5 + $0x58] sm:$0xff] }
  0x44   :  { %344 = vmatpush.msrb.mxu0 %v259_v61  ;;  %364 = vmatpush.msrb.mxu1 %v291_v62  ;;  %v412_v43 = vld [vmem:[%s1439_s5 + $0xd0] sm:$0xff]  ;;  %v411_v45 = vld [vmem:[%s1439_s5 + $0xc8] sm:$0xff]  ;;  %v410_v47 = vld [vmem:[%s1439_s5 + $0xc0] sm:$0xff] }
  0x45   :  { %336 = vmatpush.msra.mxu3 %v266_v26  ;;  %317 = vmatpush.msra.mxu2 %v232_v29  ;;  %v396_v44 = vld [vmem:[%s1439_s5 + $0x50] sm:$0xff]  ;;  %v395_v46 = vld [vmem:[%s1439_s5 + $0x48] sm:$0xff]  ;;  %v394_v48 = vld [vmem:[%s1439_s5 + $0x40] sm:$0xff] }
  0x46   :  { %345 = vmatpush.msrb.mxu0 %v257_v63  ;;  %365 = vmatpush.msrb.mxu1 %v289_v0  ;;  %v409_v49 = vld [vmem:[%s1439_s5 + $0xb8] sm:$0xff]  ;;  %v408_v50 = vld [vmem:[%s1439_s5 + $0xb0] sm:$0xff]  ;;  %v182_v51 = vld [vmem:[#allocation5] sm:$0x3] }
  0x47   :  { %337 = vmatpush.msra.mxu3 %v264_v30  ;;  %422 = vmatpush.msrb.mxu2 %v401_v35  ;;  %v407_v52 = vld [vmem:[%s1439_s5 + $0xa8] sm:$0xff]  ;;  %v184_v53 = vperm.slane %v182_v51, 0  ;;  %v185_v54 = vperm.slane %v182_v51, 1  ;;  %v393_v63 = vld [vmem:[%s1439_s5 + $0x38] sm:$0xff]  ;;  %v406_v0 = vld [vmem:[%s1439_s5 + $0xa0] sm:$0xff] }
  0x48   :  { %346 = vmatpush.msrb.mxu0 %v255_v1  ;;  %366 = vmatpush.msrb.mxu1 %v287_v2  ;;  %v392_v1 = vld [vmem:[%s1439_s5 + $0x30] sm:$0xff]  ;;  %v405_v2 = vld [vmem:[%s1439_s5 + $0x98] sm:$0xff] }
  0x49   :  { %442 = vmatpush.msrb.mxu3 %v417_v33  ;;  %423 = vmatpush.msrb.mxu2 %v400_v36  ;;  %v470_v33 = vld [vmem:[%s1441_s7 + $0x40] sm:$0xff]  ;;  %v468_v35 = vld [vmem:[%s1441_s7 + $0x30] sm:$0xff]  ;;  %v469_v36 = vld [vmem:[%s1441_s7 + $0x38] sm:$0xff] }
  0x4a   :  { %347 = vmatpush.msrb.mxu0 %v253_v3  ;;  %367 = vmatpush.msrb.mxu1 %v285_v4  ;;  %v391_v3 = vld [vmem:[%s1439_s5 + $0x28] sm:$0xff]  ;;  %v404_v4 = vld [vmem:[%s1439_s5 + $0x90] sm:$0xff]  ;;  %v558_v51 = vld [vmem:[#allocation11 + $0xd0] sm:$0xff] }
  0x4b   :  { %443 = vmatpush.msrb.mxu3 %v416_v34  ;;  %424 = vmatpush.msrb.mxu2 %v399_v38  ;;  %v471_v34 = vld [vmem:[%s1441_s7 + $0x48] sm:$0xff] }
  0x4c   :  { %348 = vmatpush.msrb.mxu0 %v251_v5  ;;  %368 = vmatpush.msrb.mxu1 %v283_v6  ;;  %v390_v5 = vld [vmem:[%s1439_s5 + $0x20] sm:$0xff]  ;;  %v403_v6 = vld [vmem:[%s1439_s5 + $0x88] sm:$0xff] }
  0x4d   :  { %444 = vmatpush.msrb.mxu3 %v415_v37  ;;  %425 = vmatpush.msrb.mxu2 %v398_v40  ;;  %v466_v37 = vld [vmem:[%s1441_s7 + $0x20] sm:$0xff]  ;;  %v467_v38 = vld [vmem:[%s1441_s7 + $0x28] sm:$0xff]  ;;  %v465_v40 = vld [vmem:[%s1441_s7 + $0x18] sm:$0xff] }
  0x4e   :  { %349 = vmatpush.msrb.mxu0 %v249_v7  ;;  %369 = vmatpush.msrb.mxu1 %v281_v8  ;;  %v389_v7 = vld [vmem:[%s1439_s5 + $0x18] sm:$0xff]  ;;  %v402_v8 = vld [vmem:[%s1439_s5 + $0x80] sm:$0xff] }
  0x4f   :  { %445 = vmatpush.msrb.mxu3 %v414_v39  ;;  %426 = vmatpush.msrb.mxu2 %v397_v42  ;;  %v464_v39 = vld [vmem:[%s1441_s7 + $0x10] sm:$0xff]  ;;  %v463_v42 = vld [vmem:[%s1441_s7 + $0x8] sm:$0xff] }
  0x50   :  { %350 = vmatpush.msrb.mxu0 %v247_v9  ;;  %370 = vmatpush.msrb.mxu1 %v279_v10  ;;  %v388_v9 = vld [vmem:[%s1439_s5 + $0x10] sm:$0xff]  ;;  %v387_v10 = vld [vmem:[%s1439_s5 + $0x8] sm:$0xff] }
  0x51   :  { %446 = vmatpush.msrb.mxu3 %v413_v41  ;;  %427 = vmatpush.msrb.mxu2 %v396_v44  ;;  %v462_v41 = vld [vmem:[%s1441_s7] sm:$0xff] }
  0x52   :  { %351 = vmatpush.msrb.mxu0 %v245_v11  ;;  %371 = vmatpush.msrb.mxu1 %v277_v12  ;;  %v386_v11 = vld [vmem:[%s1439_s5] sm:$0xff]  ;;  %v476_v12 = vld [vmem:[%s1441_s7 + $0x70] sm:$0xff] }
  0x53   :  { %447 = vmatpush.msrb.mxu3 %v412_v43  ;;  %428 = vmatpush.msrb.mxu2 %v395_v46  ;;  %v562_v43 = vld [vmem:[#allocation11 + $0xf0] sm:$0xff]  ;;  %v595_v46 = vld [vmem:[#allocation11 + $0x1f8] sm:$0xff] }
  0x54   :  { %352 = vmatpush.msrb.mxu0 %v243_v13  ;;  %372 = vmatpush.msrb.mxu1 %v275_v14  ;;  %v477_v13 = vld [vmem:[%s1441_s7 + $0x78] sm:$0xff]  ;;  %v474_v14 = vld [vmem:[%s1441_s7 + $0x60] sm:$0xff] }
  0x55   :  { %448 = vmatpush.msrb.mxu3 %v411_v45  ;;  %429 = vmatpush.msrb.mxu2 %v394_v48  ;;  %v594_v44 = vld [vmem:[#allocation11 + $0x1f0] sm:$0xff]  ;;  %v563_v45 = vld [vmem:[#allocation11 + $0xf8] sm:$0xff]  ;;  %v592_v48 = vld [vmem:[#allocation11 + $0x1e0] sm:$0xff] }
  0x56   :  { %353 = vmatpush.msrb.mxu0 %v241_v15  ;;  %373 = vmatpush.msrb.mxu1 %v273_v16  ;;  %v475_v15 = vld [vmem:[%s1441_s7 + $0x68] sm:$0xff]  ;;  %v296_v16 = vld [vmem:[#allocation8] sm:$0x3] }
  0x57   :  { %449 = vmatpush.msrb.mxu3 %v410_v47  ;;  %430 = vmatpush.msrb.mxu2 %v393_v63  ;;  %v299_v17 = vperm.slane %v296_v16, 1  ;;  %v298_v21 = vperm.slane %v296_v16, 0  ;;  %v560_v47 = vld [vmem:[#allocation11 + $0xe0] sm:$0xff] }
  0x58   :  { %354 = vmatpush.msrb.mxu0 %v239_v19  ;;  %374 = vmatpush.msrb.mxu1 %v271_v20  ;;  %v552_v63 = vld [vmem:[#allocation11 + $0xa0] sm:$0xff] }
  0x59   :  { %450 = vmatpush.msrb.mxu3 %v409_v49  ;;  %431 = vmatpush.msrb.mxu2 %v392_v1  ;;  %v561_v49 = vld [vmem:[#allocation11 + $0xe8] sm:$0xff]  ;;  %v576_v16 = vld [vmem:[#allocation11 + $0x160] sm:$0xff] }
  0x5a   :  { %355 = vmatpush.msrb.mxu0 %v237_v23  ;;  %375 = vmatpush.msrb.mxu1 %v269_v24  ;;  %v553_v1 = vld [vmem:[#allocation11 + $0xa8] sm:$0xff] }
  0x5b   :  { %451 = vmatpush.msrb.mxu3 %v408_v50  ;;  %432 = vmatpush.msrb.mxu2 %v391_v3  ;;  %v593_v50 = vld [vmem:[#allocation11 + $0x1e8] sm:$0xff]  ;;  %v550_v3 = vld [vmem:[#allocation11 + $0x90] sm:$0xff] }
  0x5c   :  { %356 = vmatpush.msrb.mxu0 %v235_v27  ;;  %376 = vmatpush.msrb.mxu1 %v267_v28 }
  0x5d   :  { %452 = vmatpush.msrb.mxu3 %v407_v52  ;;  %433 = vmatpush.msrb.mxu2 %v390_v5  ;;  %v590_v52 = vld [vmem:[#allocation11 + $0x1d0] sm:$0xff]  ;;  %v551_v5 = vld [vmem:[#allocation11 + $0x98] sm:$0xff] }
  0x5e   :  { %357 = vmatpush.msrb.mxu0 %v233_v31  ;;  %377 = vmatpush.msrb.mxu1 %v265_v32  ;;  %v472_v31 = vld [vmem:[%s1441_s7 + $0x50] sm:$0xff]  ;;  %v473_v32 = vld [vmem:[%s1441_s7 + $0x58] sm:$0xff] }
  0x5f   :  { %453 = vmatpush.msrb.mxu3 %v406_v0  ;;  %434 = vmatpush.msrb.mxu2 %v389_v7  ;;  %v584_v0 = vld [vmem:[#allocation11 + $0x1a0] sm:$0xff] }
  0x60   :  { %496 = vmatpush.msra.mxu0 %v476_v12  ;;  %516 = vmatpush.msra.mxu1 %v477_v13  ;;  %v548_v7 = vld [vmem:[#allocation11 + $0x80] sm:$0xff]  ;;  %v578_v12 = vld [vmem:[#allocation11 + $0x170] sm:$0xff]  ;;  %v547_v13 = vld [vmem:[#allocation11 + $0x78] sm:$0xff] }
  0x61   :  { %454 = vmatpush.msrb.mxu3 %v405_v2  ;;  %435 = vmatpush.msrb.mxu2 %v388_v9  ;;  %v585_v2 = vld [vmem:[#allocation11 + $0x1a8] sm:$0xff] }
  0x62   :  { %497 = vmatpush.msra.mxu0 %v474_v14  ;;  %517 = vmatpush.msra.mxu1 %v475_v15  ;;  %v549_v9 = vld [vmem:[#allocation11 + $0x88] sm:$0xff]  ;;  %v579_v14 = vld [vmem:[#allocation11 + $0x178] sm:$0xff]  ;;  %v544_v15 = vld [vmem:[#allocation11 + $0x60] sm:$0xff] }
  0x63   :  { %455 = vmatpush.msrb.mxu3 %v404_v4  ;;  %436 = vmatpush.msrb.mxu2 %v387_v10  ;;  %v582_v4 = vld [vmem:[#allocation11 + $0x190] sm:$0xff]  ;;  %v581_v10 = vld [vmem:[#allocation11 + $0x188] sm:$0xff] }
  0x64   :  { %498 = vmatpush.msra.mxu0 %v472_v31  ;;  %518 = vmatpush.msra.mxu1 %v473_v32  ;;  %v538_v32 = vld [vmem:[#allocation11 + $0x30] sm:$0xff] }
  0x65   :  { %456 = vmatpush.msrb.mxu3 %v403_v6  ;;  %437 = vmatpush.msrb.mxu2 %v386_v11  ;;  %v583_v6 = vld [vmem:[#allocation11 + $0x198] sm:$0xff]  ;;  %v546_v11 = vld [vmem:[#allocation11 + $0x70] sm:$0xff] }
  0x66   :  { %499 = vmatpush.msra.mxu0 %v470_v33  ;;  %519 = vmatpush.msra.mxu1 %v471_v34  ;;  %v570_v33 = vld [vmem:[#allocation11 + $0x130] sm:$0xff]  ;;  %v539_v34 = vld [vmem:[#allocation11 + $0x38] sm:$0xff] }
  0x67   :  { %457 = vmatpush.msrb.mxu3 %v402_v8  ;;  %v580_v8 = vld [vmem:[#allocation11 + $0x180] sm:$0xff] }
  0x68   :  { %500 = vmatpush.msra.mxu0 %v468_v35  ;;  %520 = vmatpush.msra.mxu1 %v469_v36  ;;  %v571_v35 = vld [vmem:[#allocation11 + $0x138] sm:$0xff]  ;;  %v536_v36 = vld [vmem:[#allocation11 + $0x20] sm:$0xff] }
  0x6a   :  { %501 = vmatpush.msra.mxu0 %v466_v37  ;;  %521 = vmatpush.msra.mxu1 %v467_v38  ;;  %v568_v37 = vld [vmem:[#allocation11 + $0x120] sm:$0xff]  ;;  %v537_v38 = vld [vmem:[#allocation11 + $0x28] sm:$0xff] }
  0x6c   :  { %502 = vmatpush.msra.mxu0 %v464_v39  ;;  %522 = vmatpush.msra.mxu1 %v465_v40  ;;  %v569_v39 = vld [vmem:[#allocation11 + $0x128] sm:$0xff]  ;;  %v534_v40 = vld [vmem:[#allocation11 + $0x10] sm:$0xff] }
  0x6e   :  { %503 = vmatpush.msra.mxu0 %v462_v41  ;;  %523 = vmatpush.msra.mxu1 %v463_v42  ;;  %v566_v41 = vld [vmem:[#allocation11 + $0x110] sm:$0xff]  ;;  %v535_v42 = vld [vmem:[#allocation11 + $0x18] sm:$0xff] }
  0xbc   :  { %v205_v55 = vpop.f32.mrf.mxu0  ;;  %v225_v56 = vpop.f32.mrf.mxu1 }
  0xbd   :  { %v206_v57 = vadd.f32 %v205_v55, %v184_v53  ;;  %v226_v58 = vadd.f32 %v225_v56, %v185_v54  ;;  %v559_v53 = vld [vmem:[#allocation11 + $0xd8] sm:$0xff]  ;;  %v556_v55 = vld [vmem:[#allocation11 + $0xc0] sm:$0xff] }
  0xbe   :  { %v591_v54 = vld [vmem:[#allocation11 + $0x1d8] sm:$0xff]  ;;  %v588_v56 = vld [vmem:[#allocation11 + $0x1c0] sm:$0xff] }
  0xbf   :  { %v228_v59 = vmul.f32 0.01, %v206_v57  ;;  %v229_v60 = vmul.f32 0.01, %v226_v58 }
  0xc1   :  { %v230_v61 = vmax.f32 %v206_v57, %v228_v59  ;;  %v231_v62 = vmax.f32 %v226_v58, %v229_v60  ;;  %v557_v57 = vld [vmem:[#allocation11 + $0xc8] sm:$0xff]  ;;  %v554_v59 = vld [vmem:[#allocation11 + $0xb0] sm:$0xff] }
  0xc2   :  { %v589_v58 = vld [vmem:[#allocation11 + $0x1c8] sm:$0xff]  ;;  %v586_v60 = vld [vmem:[#allocation11 + $0x1b0] sm:$0xff] }
  0xc3   :  { %318 = vmatmul.f32.vlgmr.msra.gmra.mxu2 %v230_v61  ;;  %338 = vmatmul.f32.vlgmr.msra.gmra.mxu3 %v231_v62 }
  0xc4   :  { %358 = vmatmul.f32.vlgmr.msrb.gmra.mxu0 %v230_v61  ;;  %378 = vmatmul.f32.vlgmr.msrb.gmra.mxu1 %v231_v62  ;;  %v555_v61 = vld [vmem:[#allocation11 + $0xb8] sm:$0xff] }
  0xc5   :  { %602 = vmatpush.msra.mxu2 %v562_v43  ;;  %622 = vmatpush.msra.mxu3 %v594_v44  ;;  %v587_v62 = vld [vmem:[#allocation11 + $0x1b8] sm:$0xff]  ;;  %v532_v44 = vld [vmem:[#allocation11] sm:$0xff] }
  0xc6   :  { %642 = vmatpush.msrb.mxu0 %v563_v45  ;;  %662 = vmatpush.msrb.mxu1 %v595_v46  ;;  %v567_v43 = vld [vmem:[#allocation11 + $0x118] sm:$0xff]  ;;  %v564_v45 = vld [vmem:[#allocation11 + $0x100] sm:$0xff]  ;;  %v533_v46 = vld [vmem:[#allocation11 + $0x8] sm:$0xff] }
  0xc7   :  { %603 = vmatpush.msra.mxu2 %v560_v47  ;;  %623 = vmatpush.msra.mxu3 %v592_v48  ;;  %v565_v47 = vld [vmem:[#allocation11 + $0x108] sm:$0xff]  ;;  %v717_v48 = vld [vmem:[#allocation13 + $0xf8] sm:$0xff] }
  0xc8   :  { %643 = vmatpush.msrb.mxu0 %v561_v49  ;;  %663 = vmatpush.msrb.mxu1 %v593_v50  ;;  %v716_v49 = vld [vmem:[#allocation13 + $0xf0] sm:$0xff]  ;;  %v701_v50 = vld [vmem:[#allocation13 + $0x78] sm:$0xff] }
  0xc9   :  { %604 = vmatpush.msra.mxu2 %v558_v51  ;;  %624 = vmatpush.msra.mxu3 %v590_v52  ;;  %v700_v51 = vld [vmem:[#allocation13 + $0x70] sm:$0xff]  ;;  %v715_v52 = vld [vmem:[#allocation13 + $0xe8] sm:$0xff] }
  0xca   :  { %644 = vmatpush.msrb.mxu0 %v559_v53  ;;  %664 = vmatpush.msrb.mxu1 %v591_v54  ;;  %v699_v53 = vld [vmem:[#allocation13 + $0x68] sm:$0xff]  ;;  %v714_v54 = vld [vmem:[#allocation13 + $0xe0] sm:$0xff] }
  0xcb   :  { %605 = vmatpush.msra.mxu2 %v556_v55  ;;  %625 = vmatpush.msra.mxu3 %v588_v56  ;;  %v698_v55 = vld [vmem:[#allocation13 + $0x60] sm:$0xff]  ;;  %v713_v56 = vld [vmem:[#allocation13 + $0xd8] sm:$0xff] }
  0xcc   :  { %645 = vmatpush.msrb.mxu0 %v557_v57  ;;  %665 = vmatpush.msrb.mxu1 %v589_v58  ;;  %v697_v57 = vld [vmem:[#allocation13 + $0x58] sm:$0xff]  ;;  %v712_v58 = vld [vmem:[#allocation13 + $0xd0] sm:$0xff] }
  0xcd   :  { %606 = vmatpush.msra.mxu2 %v554_v59  ;;  %626 = vmatpush.msra.mxu3 %v586_v60  ;;  %v696_v59 = vld [vmem:[#allocation13 + $0x50] sm:$0xff]  ;;  %v711_v60 = vld [vmem:[#allocation13 + $0xc8] sm:$0xff] }
  0xce   :  { %646 = vmatpush.msrb.mxu0 %v555_v61  ;;  %666 = vmatpush.msrb.mxu1 %v587_v62  ;;  %v695_v61 = vld [vmem:[#allocation13 + $0x48] sm:$0xff]  ;;  %v710_v62 = vld [vmem:[#allocation13 + $0xc0] sm:$0xff] }
  0xcf   :  { %607 = vmatpush.msra.mxu2 %v552_v63  ;;  %627 = vmatpush.msra.mxu3 %v584_v0  ;;  %v694_v63 = vld [vmem:[#allocation13 + $0x40] sm:$0xff]  ;;  %v709_v0 = vld [vmem:[#allocation13 + $0xb8] sm:$0xff] }
  0xd0   :  { %647 = vmatpush.msrb.mxu0 %v553_v1  ;;  %667 = vmatpush.msrb.mxu1 %v585_v2  ;;  %v708_v1 = vld [vmem:[#allocation13 + $0xb0] sm:$0xff] }
  0xd1   :  { %608 = vmatpush.msra.mxu2 %v550_v3  ;;  %628 = vmatpush.msra.mxu3 %v582_v4  ;;  %v478_v2 = vld [vmem:[%s1442_s8] sm:$0x3]  ;;  %v707_v3 = vld [vmem:[#allocation13 + $0xa8] sm:$0xff] }
  0xd2   :  { %648 = vmatpush.msrb.mxu0 %v551_v5  ;;  %668 = vmatpush.msrb.mxu1 %v583_v6  ;;  %v480_v4 = vperm.slane %v478_v2, 0  ;;  %v481_v5 = vperm.slane %v478_v2, 1 }
  0xd3   :  { %609 = vmatpush.msra.mxu2 %v548_v7  ;;  %629 = vmatpush.msra.mxu3 %v580_v8 }
  0xd4   :  { %649 = vmatpush.msrb.mxu0 %v549_v9  ;;  %669 = vmatpush.msrb.mxu1 %v581_v10 }
  0xd5   :  { %610 = vmatpush.msra.mxu2 %v546_v11  ;;  %630 = vmatpush.msra.mxu3 %v578_v12 }
  0xd6   :  { %650 = vmatpush.msrb.mxu0 %v547_v13  ;;  %670 = vmatpush.msrb.mxu1 %v579_v14  ;;  %v693_v14 = vld [vmem:[#allocation13 + $0x38] sm:$0xff] }
  0xd7   :  { %611 = vmatpush.msra.mxu2 %v544_v15  ;;  %631 = vmatpush.msra.mxu3 %v576_v16  ;;  %v706_v15 = vld [vmem:[#allocation13 + $0xa0] sm:$0xff]  ;;  %v692_v16 = vld [vmem:[#allocation13 + $0x30] sm:$0xff] }
 0x141   :  { %v359_v18 = vpop.f32.mrf.mxu0  ;;  %v379_v20 = vpop.f32.mrf.mxu1 }
 0x142   :  { %v360_v19 = vadd.f32 %v359_v18, %v299_v17  ;;  %v545_v17 = vld [vmem:[#allocation11 + $0x68] sm:$0xff] }
 0x143   :  { %v577_v18 = vld [vmem:[#allocation11 + $0x168] sm:$0xff]  ;;  %651 = vmatpush.msrb.mxu0 %v545_v17  ;;  %v705_v17 = vld [vmem:[#allocation13 + $0x98] sm:$0xff] }
 0x144   :  { %v380_v22 = vadd.f32 %v379_v20, %v360_v19  ;;  %v542_v19 = vld [vmem:[#allocation11 + $0x50] sm:$0xff]  ;;  %671 = vmatpush.msrb.mxu1 %v577_v18  ;;  %v691_v18 = vld [vmem:[#allocation13 + $0x28] sm:$0xff] }
 0x145   :  { %v574_v20 = vld [vmem:[#allocation11 + $0x150] sm:$0xff]  ;;  %612 = vmatpush.msra.mxu2 %v542_v19 }
 0x146   :  { %v383_v23 = vmul.f32 0.01, %v380_v22  ;;  %v319_v24 = vpop.f32.mrf.mxu2  ;;  %v339_v27 = vpop.f32.mrf.mxu3  ;;  %632 = vmatpush.msra.mxu3 %v574_v20  ;;  %v704_v19 = vld [vmem:[#allocation13 + $0x90] sm:$0xff]  ;;  %v690_v20 = vld [vmem:[#allocation13 + $0x20] sm:$0xff] }
 0x147   :  { %v320_v25 = vadd.f32 %v319_v24, %v298_v21  ;;  %v543_v21 = vld [vmem:[#allocation11 + $0x58] sm:$0xff]  ;;  %v572_v24 = vld [vmem:[#allocation11 + $0x140] sm:$0xff] }
 0x148   :  { %v385_v26 = vmax.f32 %v380_v22, %v383_v23  ;;  %v575_v22 = vld [vmem:[#allocation11 + $0x158] sm:$0xff]  ;;  %v540_v23 = vld [vmem:[#allocation11 + $0x40] sm:$0xff]  ;;  %652 = vmatpush.msrb.mxu0 %v543_v21  ;;  %633 = vmatpush.msra.mxu3 %v572_v24  ;;  %v703_v21 = vld [vmem:[#allocation13 + $0x88] sm:$0xff] }
 0x149   :  { %v340_v28 = vadd.f32 %v339_v27, %v320_v25  ;;  %v541_v25 = vld [vmem:[#allocation11 + $0x48] sm:$0xff]  ;;  %672 = vmatpush.msrb.mxu1 %v575_v22  ;;  %613 = vmatpush.msra.mxu2 %v540_v23  ;;  %v836_v27 = vld [vmem:[#allocation10] ss:$0 sm:$0xff]  ;;  %v702_v23 = vld [vmem:[#allocation13 + $0x80] sm:$0xff] }
 0x14a   :  { %458 = vmatmul.f32.vlgmr.msrb.gmra.mxu3 %v385_v26  ;;  %v573_v26 = vld [vmem:[#allocation11 + $0x148] sm:$0xff]  ;;  %653 = vmatpush.msrb.mxu0 %v541_v25  ;;  %v689_v22 = vld [vmem:[#allocation13 + $0x18] sm:$0xff]  ;;  %v688_v24 = vld [vmem:[#allocation13 + $0x10] sm:$0xff] }
 0x14b   :  { %v382_v29 = vmul.f32 0.01, %v340_v28  ;;  %673 = vmatpush.msrb.mxu1 %v573_v26  ;;  %614 = vmatpush.msra.mxu2 %v538_v32  ;;  %v687_v25 = vld [vmem:[#allocation13 + $0x8] sm:$0xff]  ;;  %v686_v26 = vld [vmem:[#allocation13] sm:$0xff] }
 0x14c   :  { %634 = vmatpush.msra.mxu3 %v570_v33  ;;  %654 = vmatpush.msrb.mxu0 %v539_v34 }
 0x14d   :  { %v384_v30 = vmax.f32 %v340_v28, %v382_v29  ;;  %674 = vmatpush.msrb.mxu1 %v571_v35  ;;  %615 = vmatpush.msra.mxu2 %v536_v36 }
 0x14e   :  { %635 = vmatpush.msra.mxu3 %v568_v37  ;;  %655 = vmatpush.msrb.mxu0 %v537_v38 }
 0x14f   :  { %438 = vmatmul.f32.vlgmr.msrb.gmra.mxu2 %v384_v30  ;;  %675 = vmatpush.msrb.mxu1 %v569_v39 }
 0x150   :  { %616 = vmatpush.msra.mxu2 %v534_v40  ;;  %636 = vmatpush.msra.mxu3 %v566_v41 }
 0x151   :  { %656 = vmatpush.msrb.mxu0 %v535_v42  ;;  %676 = vmatpush.msrb.mxu1 %v567_v43  ;;  %v837_v42 = vld [vmem:[%s1446_s12] ss:$0 sm:$0xff] }
 0x152   :  { %617 = vmatpush.msra.mxu2 %v532_v44  ;;  %637 = vmatpush.msra.mxu3 %v564_v45 }
 0x153   :  { %657 = vmatpush.msrb.mxu0 %v533_v46  ;;  %677 = vmatpush.msrb.mxu1 %v565_v47 }
 0x154   :  { %742 = vmatpush.msrb.mxu3 %v717_v48  ;;  %722 = vmatpush.msrb.mxu2 %v701_v50 }
 0x156   :  { %743 = vmatpush.msrb.mxu3 %v716_v49  ;;  %723 = vmatpush.msrb.mxu2 %v700_v51 }
 0x158   :  { %744 = vmatpush.msrb.mxu3 %v715_v52  ;;  %724 = vmatpush.msrb.mxu2 %v699_v53 }
 0x15a   :  { %745 = vmatpush.msrb.mxu3 %v714_v54  ;;  %725 = vmatpush.msrb.mxu2 %v698_v55 }
 0x15c   :  { %746 = vmatpush.msrb.mxu3 %v713_v56  ;;  %726 = vmatpush.msrb.mxu2 %v697_v57 }
 0x15e   :  { %747 = vmatpush.msrb.mxu3 %v712_v58  ;;  %727 = vmatpush.msrb.mxu2 %v696_v59 }
 0x160   :  { %748 = vmatpush.msrb.mxu3 %v711_v60  ;;  %728 = vmatpush.msrb.mxu2 %v695_v61 }
 0x162   :  { %749 = vmatpush.msrb.mxu3 %v710_v62  ;;  %729 = vmatpush.msrb.mxu2 %v694_v63 }
 0x164   :  { %750 = vmatpush.msrb.mxu3 %v709_v0  ;;  %730 = vmatpush.msrb.mxu2 %v693_v14 }
 0x166   :  { %751 = vmatpush.msrb.mxu3 %v708_v1  ;;  %731 = vmatpush.msrb.mxu2 %v692_v16 }
 0x168   :  { %752 = vmatpush.msrb.mxu3 %v707_v3  ;;  %732 = vmatpush.msrb.mxu2 %v691_v18 }
 0x16a   :  { %753 = vmatpush.msrb.mxu3 %v706_v15  ;;  %733 = vmatpush.msrb.mxu2 %v690_v20 }
 0x16c   :  { %754 = vmatpush.msrb.mxu3 %v705_v17  ;;  %734 = vmatpush.msrb.mxu2 %v689_v22 }
 0x16e   :  { %755 = vmatpush.msrb.mxu3 %v704_v19  ;;  %735 = vmatpush.msrb.mxu2 %v688_v24 }
 0x170   :  { %756 = vmatpush.msrb.mxu3 %v703_v21  ;;  %736 = vmatpush.msrb.mxu2 %v687_v25 }
 0x172   :  { %757 = vmatpush.msrb.mxu3 %v702_v23  ;;  %737 = vmatpush.msrb.mxu2 %v686_v26 }
 0x1cd   :  { %v459_v30 = vpop.f32.mrf.mxu3 }
 0x1d2   :  { %v439_v28 = vpop.f32.mrf.mxu2 }
 0x1d3   :  { %v440_v29 = vadd.f32 %v836_v27, %v439_v28  ;;  %v596_v27 = vld [vmem:[%s1444_s10] sm:$0x3] }
 0x1d4   :  { %v599_v28 = vperm.slane %v596_v27, 1  ;;  %v598_v32 = vperm.slane %v596_v27, 0 }
 0x1d5   :  { %v460_v31 = vadd.f32 %v459_v30, %v440_v29 }
 0x1d7   :  { %820 = vmatmul.msk.f32.vlgmr.msra.gmra.mxu0 %vm484_vm0, %v460_v31  ;;  %821 = vmatmul.msk.f32.vlgmr.msra.gmra.mxu1 %vm484_vm0, %v460_v31  ;;  %782 = vst.msk [vmem:[#allocation15] sm:$0xf] %vm781_vm1, %v460_v31 }
 0x1d8   :  { %805 = dma.vmem_to_hbm [thread:$0]  %s801_s26, 64, %s803_s27, [#allocation16]  }
 0x254   :  { %v505_v6 = vpop.f32.mrf.mxu0  ;;  %v525_v7 = vpop.f32.mrf.mxu1 }
 0x255   :  { %v506_v8 = vadd.f32 %v505_v6, %v480_v4  ;;  %v526_v9 = vadd.f32 %v525_v7, %v481_v5 }
 0x257   :  { %v528_v10 = vmul.f32 0.01, %v506_v8  ;;  %v529_v11 = vmul.f32 0.01, %v526_v9 }
 0x259   :  { %v530_v12 = vmax.f32 %v506_v8, %v528_v10  ;;  %v531_v13 = vmax.f32 %v526_v9, %v529_v11 }
 0x25b   :  { %618 = vmatmul.f32.vlgmr.msra.gmra.mxu2 %v530_v12  ;;  %638 = vmatmul.f32.vlgmr.msra.gmra.mxu3 %v531_v13 }
 0x25c   :  { %658 = vmatmul.f32.vlgmr.msrb.gmra.mxu0 %v530_v12  ;;  %678 = vmatmul.f32.vlgmr.msrb.gmra.mxu1 %v531_v13 }
 0x2d9   :  { %v659_v29 = vpop.f32.mrf.mxu0  ;;  %v679_v31 = vpop.f32.mrf.mxu1 }
 0x2da   :  { %v660_v30 = vadd.f32 %v659_v29, %v599_v28 }
 0x2dc   :  { %v680_v33 = vadd.f32 %v679_v31, %v660_v30 }
 0x2de   :  { %v683_v34 = vmul.f32 0.01, %v680_v33  ;;  %v619_v35 = vpop.f32.mrf.mxu2  ;;  %v639_v38 = vpop.f32.mrf.mxu3 }
 0x2df   :  { %v620_v36 = vadd.f32 %v619_v35, %v598_v32 }
 0x2e0   :  { %v685_v37 = vmax.f32 %v680_v33, %v683_v34 }
 0x2e1   :  { %v640_v39 = vadd.f32 %v639_v38, %v620_v36 }
 0x2e2   :  { %758 = vmatmul.f32.vlgmr.msrb.gmra.mxu3 %v685_v37 }
 0x2e3   :  { %v682_v40 = vmul.f32 0.01, %v640_v39 }
 0x2e5   :  { %v684_v41 = vmax.f32 %v640_v39, %v682_v40 }
 0x2e7   :  { %738 = vmatmul.f32.vlgmr.msrb.gmra.mxu2 %v684_v41 }
 0x365   :  { %v759_v45 = vpop.f32.mrf.mxu3 }
 0x36a   :  { %v739_v43 = vpop.f32.mrf.mxu2 }
 0x36b   :  { %v740_v44 = vadd.f32 %v837_v42, %v739_v43 }
 0x36d   :  { %v760_v46 = vadd.f32 %v759_v45, %v740_v44 }
 0x36f   :  { %v822_v47 = vmul.f32 -1.442695, %v760_v46 }
 0x371   :  { %838 = vpow2.f32 %v822_v47 }
 0x377   :  { %v839_v48 = vpop.eup %838 }
 0x378   :  { %v765_v49 = vadd.f32 1.0, %v839_v48 }
 0x37a   :  { %840 = vrcp.f32 %v765_v49  ;;  %v777_v53 = vand.u32 2147483648, %v765_v49  ;;  %v775_v55 = vand.u32 2147483647, %v765_v49  ;;  %vm771_vm3 = vweird.f32 %v765_v49 }
 0x37c   :  { %v778_v57 = vor.u32 1.1754944e-38, %v777_v53  ;;  %vm776_vm5 = vcmp.eq.f32.partialorder %v775_v55, 8.507059e+37 }
 0x380   :  { %v841_v50 = vpop.eup %840 }
 0x381   :  { %v767_v51 = vmul.f32 %v841_v50, %v765_v49  ;;  %vm772_vm2 = vweird.f32 %v841_v50 }
 0x382   :  { %vm773_vm4 = vmor %vm771_vm3, %vm772_vm2 }
 0x383   :  { %v768_v52 = vsub.f32 1.0, %v767_v51 }
 0x385   :  { %v769_v54 = vmul.f32 %v841_v50, %v768_v52 }
 0x387   :  { %v770_v56 = vadd.f32 %v841_v50, %v769_v54 }
 0x389   :  { %v774_v58 = vsel %vm773_vm4, %v841_v50, %v770_v56 }
 0x38a   :  { %v779_v59 = vsel %vm776_vm5, %v778_v57, %v774_v58 }
 0x38b   :  { %783 = vst [vmem:[#allocation14] sm:$0xf] %v779_v59 }
 0x38c   :  { %794 = dma.vmem_to_hbm [thread:$0]  %s790_s6, 64, %s792_s11, [#allocation4]  }
 0x38d   :  { %1066 = dma.done.wait [#allocation4], 64  }
 0x38e   :  { %1067 = vsyncadd [#allocation4], 4294967232 }
 0x38f   :  { %1068 = dma.done.wait [#allocation16], 64  }
 0x390   :  { %1069 = vsyncadd [#allocation16], 4294967232 }
 0x391   :  { %814 = vsyncpa [#allocation3], 1 }
 0x392   :  { %815 = vsyncpa [#allocation6], 1 }
 0x393   :  { %816 = vsyncpa [#allocation9], 1 }
 0x394   :  { %817 = vsyncpa [#allocation12], 1 }
 0x395   :  { %818 = vsyncpa [#allocation4], 1 }
 0x396   :  { %819 = vsyncpa [#allocation16], 1 }

</bundles_post_ra>
